<compile_context>
chip_gen: v5e
topology: v5e:2x2
jax: 0.10.0
libtpu: 0.0.40
codegen_flags: <defaults>
</compile_context>

<pallas_src>
import math

import jax
import jax.numpy as jnp
from jax.experimental import pallas as pl
from jax.experimental.pallas import tpu as pltpu

_LANES = 128


def _conv1x1_relu_kernel(w_ref, b_ref, x_ref, o_ref):
    """w_ref: (O*C,) f32 SMEM, b_ref: (O,) f32 SMEM,
    x_ref: (1, C, TR, 128) VMEM tile, o_ref: (1, O, TR, 128) VMEM tile."""
    C = x_ref.shape[1]
    O = o_ref.shape[1]
    # Load each input channel once as a dense (TR, 128) slab (all 8 sublanes).
    xs = [x_ref[0, c].astype(jnp.float32) for c in range(C)]
    for o in range(O):
        acc = xs[0] * w_ref[o * C]
        for c in range(1, C):
            acc = acc + xs[c] * w_ref[o * C + c]
        o_ref[0, o] = jnp.maximum(acc + b_ref[o], 0.0).astype(o_ref.dtype)


def _plan_spatial(n, c, o, hw):
    """Plan the (rows, 128) spatial layout.

    Returns (padded_hw, total_rows, tile_rows, n_tiles).  tile_rows is either
    the full row extent (legal for any value) or a multiple of 8 sized against
    a per-step VMEM budget.  Output lane width is always a dense 128.
    """
    rows = -(-hw // _LANES)                              # ceil(hw / 128)
    # Per-step single-buffer bytes for the x + out blocks; double-buffered
    # this stays well under the 32 MiB default scoped VMEM (v7x-safe).
    budget = 8 * 1024 * 1024
    max_rows = max(8, (budget // ((c + o) * _LANES * 4) // 8) * 8)
    if rows <= max_rows:
        tile_rows, n_tiles = rows, 1
        # v7x megacore: prefer >= 2 parallel grid steps when the batch alone
        # does not provide them and the slab is big enough to split.
        if n == 1 and rows >= 16:
            tile_rows = ((rows + 15) // 16) * 8
            n_tiles = 2
            rows = tile_rows * 2
    else:
        tile_rows = max_rows
        n_tiles = -(-rows // tile_rows)
        rows = tile_rows * n_tiles
    return rows * _LANES, rows, tile_rows, n_tiles


def phd_conv2d_size1(x, weight, bias):
    """Forward pass of PHD_conv2d_size1.

    x:      (N, C, H, W) float32   (NCHW, like the PyTorch module)
    weight: (O, C, 1, 1) float32
    bias:   (O,)         float32
    returns (N, O, H, W) float32
    """
    N, C, H, W = x.shape
    O = weight.shape[0]
    HW = H * W

    hwp, rows, tile_rows, n_tiles = _plan_spatial(N, C, O, HW)

    x3 = x.reshape(N, C, HW)                      # free: spatially contiguous
    if hwp != HW:
        x3 = jnp.pad(x3, ((0, 0), (0, 0), (0, hwp - HW)))
    x4 = x3.reshape(N, C, rows, _LANES)           # free split of last dim

    w_flat = weight.reshape(O * C).astype(jnp.float32)   # (O*C,) -> SMEM
    b_flat = bias.reshape(O).astype(jnp.float32)         # (O,)   -> SMEM

    cost = pl.CostEstimate(
        flops=2 * N * HW * C * O,
        transcendentals=0,
        bytes_accessed=4 * (N * (C + O) * hwp + O * C + O),
    )

    out4 = pl.pallas_call(
        _conv1x1_relu_kernel,
        out_shape=jax.ShapeDtypeStruct((N, O, rows, _LANES), x.dtype),
        grid=(N, n_tiles),
        in_specs=[
            pl.BlockSpec(memory_space=pltpu.MemorySpace.SMEM),   # weight
            pl.BlockSpec(memory_space=pltpu.MemorySpace.SMEM),   # bias
            pl.BlockSpec((1, C, tile_rows, _LANES),
                         lambda n, s: (n, 0, s, 0)),             # x tile
        ],
        out_specs=pl.BlockSpec((1, O, tile_rows, _LANES),
                               lambda n, s: (n, 0, s, 0)),
        compiler_params=pltpu.CompilerParams(
            dimension_semantics=("parallel", "parallel")),
        cost_estimate=cost,
    )(w_flat, b_flat, x4)

    out3 = out4.reshape(N, O, hwp)
    if hwp != HW:
        out3 = out3[:, :, :HW]
    return out3.reshape(N, O, H, W)               # free reshape back to NCHW


def init_params(key, in_dim, out_dim):
    """Deterministic init matching PyTorch reset_parameters():
    kaiming_uniform_(a=sqrt(5)) on a (O, C, 1, 1) weight reduces to
    U(-1/sqrt(fan_in), 1/sqrt(fan_in)) with fan_in = in_dim; bias uses the
    same bound."""
    kw, kb = jax.random.split(key)
    bound = 1.0 / math.sqrt(in_dim * 1 * 1)
    weight = jax.random.uniform(
        kw, (out_dim, in_dim, 1, 1), jnp.float32, -bound, bound)
    bias = jax.random.uniform(kb, (out_dim,), jnp.float32, -bound, bound)
    return weight, bias


def _reference(x, weight, bias):
    o = weight.shape[0]
    ref = jnp.einsum("nchw,oc->nohw", x, weight.reshape(o, weight.shape[1]))
    return jnp.maximum(ref + bias.reshape(1, o, 1, 1), 0.0)


if __name__ == "__main__":
    key = jax.random.PRNGKey(0)
    k_x1, k_x2, k_p = jax.random.split(key, 3)

    in_dim, out_dim = 4, 8
    weight, bias = init_params(k_p, in_dim, out_dim)

    # Module docstring: input (N, C, H=1, W=20*(4**division)).
    # division=3 -> W=1280 (128-aligned lane path), division=2 -> W=320
    # (exercises the pad-to-128 / full-extent-rows path).
    for k_x, (N, H, W) in ((k_x1, (2, 1, 1280)), (k_x2, (2, 1, 320))):
        x = jax.random.normal(k_x, (N, in_dim, H, W), jnp.float32)
        out = phd_conv2d_size1(x, weight, bias)
        jax.block_until_ready(out)
        ref = _reference(x, weight, bias)
        assert out.shape == (N, out_dim, H, W)
        assert jnp.allclose(out, ref, atol=1e-5, rtol=1e-5)

    print("KERNEL_OK")
</pallas_src>

<mosaic_0001>
module attributes {stable_mosaic.version = 11 : i64} {
  func.func @_conv1x1_relu_kernel(%arg0: i32, %arg1: i32, %arg2: memref<32xf32, #tpu.memory_space<smem>>, %arg3: memref<8xf32, #tpu.memory_space<smem>>, %arg4: memref<1x4x10x128xf32, #tpu.memory_space<vmem>>, %arg5: memref<1x8x10x128xf32, #tpu.memory_space<vmem>>) attributes {dimension_semantics = [#tpu.dimension_semantics<parallel>, #tpu.dimension_semantics<parallel>], iteration_bounds = array<i64: 2, 1>, scalar_prefetch = 0 : i64, scratch_operands = 0 : i64, tpu.core_type = #tpu.core_type<tc>, window_params = [{transform_indices = @transform_0, window_bounds = array<i64: 32>}, {transform_indices = @transform_1, window_bounds = array<i64: 8>}, {transform_indices = @transform_2, window_bounds = array<i64: 1, 4, 10, 128>}, {transform_indices = @transform_3, window_bounds = array<i64: 1, 8, 10, 128>}]} {
    %c0 = arith.constant 0 : index
    %c0_0 = arith.constant 0 : index
    %c0_1 = arith.constant 0 : index
    %c0_2 = arith.constant 0 : index
    %0 = vector.load %arg4[%c0, %c0_0, %c0_1, %c0_2] : memref<1x4x10x128xf32, #tpu.memory_space<vmem>>, vector<1x1x10x128xf32>
    %1 = vector.shape_cast %0 : vector<1x1x10x128xf32> to vector<10x128xf32>
    %c0_3 = arith.constant 0 : index
    %c1 = arith.constant 1 : index
    %c0_4 = arith.constant 0 : index
    %c0_5 = arith.constant 0 : index
    %2 = vector.load %arg4[%c0_3, %c1, %c0_4, %c0_5] : memref<1x4x10x128xf32, #tpu.memory_space<vmem>>, vector<1x1x10x128xf32>
    %3 = vector.shape_cast %2 : vector<1x1x10x128xf32> to vector<10x128xf32>
    %c0_6 = arith.constant 0 : index
    %c2 = arith.constant 2 : index
    %c0_7 = arith.constant 0 : index
    %c0_8 = arith.constant 0 : index
    %4 = vector.load %arg4[%c0_6, %c2, %c0_7, %c0_8] : memref<1x4x10x128xf32, #tpu.memory_space<vmem>>, vector<1x1x10x128xf32>
    %5 = vector.shape_cast %4 : vector<1x1x10x128xf32> to vector<10x128xf32>
    %c0_9 = arith.constant 0 : index
    %c3 = arith.constant 3 : index
    %c0_10 = arith.constant 0 : index
    %c0_11 = arith.constant 0 : index
    %6 = vector.load %arg4[%c0_9, %c3, %c0_10, %c0_11] : memref<1x4x10x128xf32, #tpu.memory_space<vmem>>, vector<1x1x10x128xf32>
    %7 = vector.shape_cast %6 : vector<1x1x10x128xf32> to vector<10x128xf32>
    %c0_12 = arith.constant 0 : index
    %8 = memref.load %arg2[%c0_12] : memref<32xf32, #tpu.memory_space<smem>>
    %9 = vector.broadcast %8 : f32 to vector<10x128xf32>
    %10 = arith.mulf %1, %9 : vector<10x128xf32>
    %c1_13 = arith.constant 1 : index
    %11 = memref.load %arg2[%c1_13] : memref<32xf32, #tpu.memory_space<smem>>
    %12 = vector.broadcast %11 : f32 to vector<10x128xf32>
    %13 = arith.mulf %3, %12 : vector<10x128xf32>
    %14 = arith.addf %10, %13 : vector<10x128xf32>
    %c2_14 = arith.constant 2 : index
    %15 = memref.load %arg2[%c2_14] : memref<32xf32, #tpu.memory_space<smem>>
    %16 = vector.broadcast %15 : f32 to vector<10x128xf32>
    %17 = arith.mulf %5, %16 : vector<10x128xf32>
    %18 = arith.addf %14, %17 : vector<10x128xf32>
    %c3_15 = arith.constant 3 : index
    %19 = memref.load %arg2[%c3_15] : memref<32xf32, #tpu.memory_space<smem>>
    %20 = vector.broadcast %19 : f32 to vector<10x128xf32>
    %21 = arith.mulf %7, %20 : vector<10x128xf32>
    %22 = arith.addf %18, %21 : vector<10x128xf32>
    %c0_16 = arith.constant 0 : index
    %23 = memref.load %arg3[%c0_16] : memref<8xf32, #tpu.memory_space<smem>>
    %24 = vector.broadcast %23 : f32 to vector<10x128xf32>
    %25 = arith.addf %22, %24 : vector<10x128xf32>
    %cst = arith.constant 0.000000e+00 : f32
    %26 = vector.broadcast %cst : f32 to vector<10x128xf32>
    %27 = arith.maximumf %25, %26 : vector<10x128xf32>
    %c0_17 = arith.constant 0 : index
    %c0_18 = arith.constant 0 : index
    %c0_19 = arith.constant 0 : index
    %c0_20 = arith.constant 0 : index
    %28 = vector.load %arg5[%c0_17, %c0_18, %c0_19, %c0_20] : memref<1x8x10x128xf32, #tpu.memory_space<vmem>>, vector<1x1x10x128xf32>
    %29 = vector.shape_cast %28 : vector<1x1x10x128xf32> to vector<10x128xf32>
    %30 = vector.shape_cast %27 : vector<10x128xf32> to vector<1x1x10x128xf32>
    tpu.vector_store %arg5[%c0_17, %c0_18, %c0_19, %c0_20], %30 {strides = array<i32>} : memref<1x8x10x128xf32, #tpu.memory_space<vmem>>, vector<1x1x10x128xf32>,
    %c4 = arith.constant 4 : index
    %31 = memref.load %arg2[%c4] : memref<32xf32, #tpu.memory_space<smem>>
    %32 = vector.broadcast %31 : f32 to vector<10x128xf32>
    %33 = arith.mulf %1, %32 : vector<10x128xf32>
    %c5 = arith.constant 5 : index
    %34 = memref.load %arg2[%c5] : memref<32xf32, #tpu.memory_space<smem>>
    %35 = vector.broadcast %34 : f32 to vector<10x128xf32>
    %36 = arith.mulf %3, %35 : vector<10x128xf32>
    %37 = arith.addf %33, %36 : vector<10x128xf32>
    %c6 = arith.constant 6 : index
    %38 = memref.load %arg2[%c6] : memref<32xf32, #tpu.memory_space<smem>>
    %39 = vector.broadcast %38 : f32 to vector<10x128xf32>
    %40 = arith.mulf %5, %39 : vector<10x128xf32>
    %41 = arith.addf %37, %40 : vector<10x128xf32>
    %c7 = arith.constant 7 : index
    %42 = memref.load %arg2[%c7] : memref<32xf32, #tpu.memory_space<smem>>
    %43 = vector.broadcast %42 : f32 to vector<10x128xf32>
    %44 = arith.mulf %7, %43 : vector<10x128xf32>
    %45 = arith.addf %41, %44 : vector<10x128xf32>
    %c1_21 = arith.constant 1 : index
    %46 = memref.load %arg3[%c1_21] : memref<8xf32, #tpu.memory_space<smem>>
    %47 = vector.broadcast %46 : f32 to vector<10x128xf32>
    %48 = arith.addf %45, %47 : vector<10x128xf32>
    %cst_22 = arith.constant 0.000000e+00 : f32
    %49 = vector.broadcast %cst_22 : f32 to vector<10x128xf32>
    %50 = arith.maximumf %48, %49 : vector<10x128xf32>
    %c0_23 = arith.constant 0 : index
    %c1_24 = arith.constant 1 : index
    %c0_25 = arith.constant 0 : index
    %c0_26 = arith.constant 0 : index
    %51 = vector.load %arg5[%c0_23, %c1_24, %c0_25, %c0_26] : memref<1x8x10x128xf32, #tpu.memory_space<vmem>>, vector<1x1x10x128xf32>
    %52 = vector.shape_cast %51 : vector<1x1x10x128xf32> to vector<10x128xf32>
    %53 = vector.shape_cast %50 : vector<10x128xf32> to vector<1x1x10x128xf32>
    tpu.vector_store %arg5[%c0_23, %c1_24, %c0_25, %c0_26], %53 {strides = array<i32>} : memref<1x8x10x128xf32, #tpu.memory_space<vmem>>, vector<1x1x10x128xf32>,
    %c8 = arith.constant 8 : index
    %54 = memref.load %arg2[%c8] : memref<32xf32, #tpu.memory_space<smem>>
    %55 = vector.broadcast %54 : f32 to vector<10x128xf32>
    %56 = arith.mulf %1, %55 : vector<10x128xf32>
    %c9 = arith.constant 9 : index
    %57 = memref.load %arg2[%c9] : memref<32xf32, #tpu.memory_space<smem>>
    %58 = vector.broadcast %57 : f32 to vector<10x128xf32>
    %59 = arith.mulf %3, %58 : vector<10x128xf32>
    %60 = arith.addf %56, %59 : vector<10x128xf32>
    %c10 = arith.constant 10 : index
    %61 = memref.load %arg2[%c10] : memref<32xf32, #tpu.memory_space<smem>>
    %62 = vector.broadcast %61 : f32 to vector<10x128xf32>
    %63 = arith.mulf %5, %62 : vector<10x128xf32>
    %64 = arith.addf %60, %63 : vector<10x128xf32>
    %c11 = arith.constant 11 : index
    %65 = memref.load %arg2[%c11] : memref<32xf32, #tpu.memory_space<smem>>
    %66 = vector.broadcast %65 : f32 to vector<10x128xf32>
    %67 = arith.mulf %7, %66 : vector<10x128xf32>
    %68 = arith.addf %64, %67 : vector<10x128xf32>
    %c2_27 = arith.constant 2 : index
    %69 = memref.load %arg3[%c2_27] : memref<8xf32, #tpu.memory_space<smem>>
    %70 = vector.broadcast %69 : f32 to vector<10x128xf32>
    %71 = arith.addf %68, %70 : vector<10x128xf32>
    %cst_28 = arith.constant 0.000000e+00 : f32
    %72 = vector.broadcast %cst_28 : f32 to vector<10x128xf32>
    %73 = arith.maximumf %71, %72 : vector<10x128xf32>
    %c0_29 = arith.constant 0 : index
    %c2_30 = arith.constant 2 : index
    %c0_31 = arith.constant 0 : index
    %c0_32 = arith.constant 0 : index
    %74 = vector.load %arg5[%c0_29, %c2_30, %c0_31, %c0_32] : memref<1x8x10x128xf32, #tpu.memory_space<vmem>>, vector<1x1x10x128xf32>
    %75 = vector.shape_cast %74 : vector<1x1x10x128xf32> to vector<10x128xf32>
    %76 = vector.shape_cast %73 : vector<10x128xf32> to vector<1x1x10x128xf32>
    tpu.vector_store %arg5[%c0_29, %c2_30, %c0_31, %c0_32], %76 {strides = array<i32>} : memref<1x8x10x128xf32, #tpu.memory_space<vmem>>, vector<1x1x10x128xf32>,
    %c12 = arith.constant 12 : index
    %77 = memref.load %arg2[%c12] : memref<32xf32, #tpu.memory_space<smem>>
    %78 = vector.broadcast %77 : f32 to vector<10x128xf32>
    %79 = arith.mulf %1, %78 : vector<10x128xf32>
    %c13 = arith.constant 13 : index
    %80 = memref.load %arg2[%c13] : memref<32xf32, #tpu.memory_space<smem>>
    %81 = vector.broadcast %80 : f32 to vector<10x128xf32>
    %82 = arith.mulf %3, %81 : vector<10x128xf32>
    %83 = arith.addf %79, %82 : vector<10x128xf32>
    %c14 = arith.constant 14 : index
    %84 = memref.load %arg2[%c14] : memref<32xf32, #tpu.memory_space<smem>>
    %85 = vector.broadcast %84 : f32 to vector<10x128xf32>
    %86 = arith.mulf %5, %85 : vector<10x128xf32>
    %87 = arith.addf %83, %86 : vector<10x128xf32>
    %c15 = arith.constant 15 : index
    %88 = memref.load %arg2[%c15] : memref<32xf32, #tpu.memory_space<smem>>
    %89 = vector.broadcast %88 : f32 to vector<10x128xf32>
    %90 = arith.mulf %7, %89 : vector<10x128xf32>
    %91 = arith.addf %87, %90 : vector<10x128xf32>
    %c3_33 = arith.constant 3 : index
    %92 = memref.load %arg3[%c3_33] : memref<8xf32, #tpu.memory_space<smem>>
    %93 = vector.broadcast %92 : f32 to vector<10x128xf32>
    %94 = arith.addf %91, %93 : vector<10x128xf32>
    %cst_34 = arith.constant 0.000000e+00 : f32
    %95 = vector.broadcast %cst_34 : f32 to vector<10x128xf32>
    %96 = arith.maximumf %94, %95 : vector<10x128xf32>
    %c0_35 = arith.constant 0 : index
    %c3_36 = arith.constant 3 : index
    %c0_37 = arith.constant 0 : index
    %c0_38 = arith.constant 0 : index
    %97 = vector.load %arg5[%c0_35, %c3_36, %c0_37, %c0_38] : memref<1x8x10x128xf32, #tpu.memory_space<vmem>>, vector<1x1x10x128xf32>
    %98 = vector.shape_cast %97 : vector<1x1x10x128xf32> to vector<10x128xf32>
    %99 = vector.shape_cast %96 : vector<10x128xf32> to vector<1x1x10x128xf32>
    tpu.vector_store %arg5[%c0_35, %c3_36, %c0_37, %c0_38], %99 {strides = array<i32>} : memref<1x8x10x128xf32, #tpu.memory_space<vmem>>, vector<1x1x10x128xf32>,
    %c16 = arith.constant 16 : index
    %100 = memref.load %arg2[%c16] : memref<32xf32, #tpu.memory_space<smem>>
    %101 = vector.broadcast %100 : f32 to vector<10x128xf32>
    %102 = arith.mulf %1, %101 : vector<10x128xf32>
    %c17 = arith.constant 17 : index
    %103 = memref.load %arg2[%c17] : memref<32xf32, #tpu.memory_space<smem>>
    %104 = vector.broadcast %103 : f32 to vector<10x128xf32>
    %105 = arith.mulf %3, %104 : vector<10x128xf32>
    %106 = arith.addf %102, %105 : vector<10x128xf32>
    %c18 = arith.constant 18 : index
    %107 = memref.load %arg2[%c18] : memref<32xf32, #tpu.memory_space<smem>>
    %108 = vector.broadcast %107 : f32 to vector<10x128xf32>
    %109 = arith.mulf %5, %108 : vector<10x128xf32>
    %110 = arith.addf %106, %109 : vector<10x128xf32>
    %c19 = arith.constant 19 : index
    %111 = memref.load %arg2[%c19] : memref<32xf32, #tpu.memory_space<smem>>
    %112 = vector.broadcast %111 : f32 to vector<10x128xf32>
    %113 = arith.mulf %7, %112 : vector<10x128xf32>
    %114 = arith.addf %110, %113 : vector<10x128xf32>
    %c4_39 = arith.constant 4 : index
    %115 = memref.load %arg3[%c4_39] : memref<8xf32, #tpu.memory_space<smem>>
    %116 = vector.broadcast %115 : f32 to vector<10x128xf32>
    %117 = arith.addf %114, %116 : vector<10x128xf32>
    %cst_40 = arith.constant 0.000000e+00 : f32
    %118 = vector.broadcast %cst_40 : f32 to vector<10x128xf32>
    %119 = arith.maximumf %117, %118 : vector<10x128xf32>
    %c0_41 = arith.constant 0 : index
    %c4_42 = arith.constant 4 : index
    %c0_43 = arith.constant 0 : index
    %c0_44 = arith.constant 0 : index
    %120 = vector.load %arg5[%c0_41, %c4_42, %c0_43, %c0_44] : memref<1x8x10x128xf32, #tpu.memory_space<vmem>>, vector<1x1x10x128xf32>
    %121 = vector.shape_cast %120 : vector<1x1x10x128xf32> to vector<10x128xf32>
    %122 = vector.shape_cast %119 : vector<10x128xf32> to vector<1x1x10x128xf32>
    tpu.vector_store %arg5[%c0_41, %c4_42, %c0_43, %c0_44], %122 {strides = array<i32>} : memref<1x8x10x128xf32, #tpu.memory_space<vmem>>, vector<1x1x10x128xf32>,
    %c20 = arith.constant 20 : index
    %123 = memref.load %arg2[%c20] : memref<32xf32, #tpu.memory_space<smem>>
    %124 = vector.broadcast %123 : f32 to vector<10x128xf32>
    %125 = arith.mulf %1, %124 : vector<10x128xf32>
    %c21 = arith.constant 21 : index
    %126 = memref.load %arg2[%c21] : memref<32xf32, #tpu.memory_space<smem>>
    %127 = vector.broadcast %126 : f32 to vector<10x128xf32>
    %128 = arith.mulf %3, %127 : vector<10x128xf32>
    %129 = arith.addf %125, %128 : vector<10x128xf32>
    %c22 = arith.constant 22 : index
    %130 = memref.load %arg2[%c22] : memref<32xf32, #tpu.memory_space<smem>>
    %131 = vector.broadcast %130 : f32 to vector<10x128xf32>
    %132 = arith.mulf %5, %131 : vector<10x128xf32>
    %133 = arith.addf %129, %132 : vector<10x128xf32>
    %c23 = arith.constant 23 : index
    %134 = memref.load %arg2[%c23] : memref<32xf32, #tpu.memory_space<smem>>
    %135 = vector.broadcast %134 : f32 to vector<10x128xf32>
    %136 = arith.mulf %7, %135 : vector<10x128xf32>
    %137 = arith.addf %133, %136 : vector<10x128xf32>
    %c5_45 = arith.constant 5 : index
    %138 = memref.load %arg3[%c5_45] : memref<8xf32, #tpu.memory_space<smem>>
    %139 = vector.broadcast %138 : f32 to vector<10x128xf32>
    %140 = arith.addf %137, %139 : vector<10x128xf32>
    %cst_46 = arith.constant 0.000000e+00 : f32
    %141 = vector.broadcast %cst_46 : f32 to vector<10x128xf32>
    %142 = arith.maximumf %140, %141 : vector<10x128xf32>
    %c0_47 = arith.constant 0 : index
    %c5_48 = arith.constant 5 : index
    %c0_49 = arith.constant 0 : index
    %c0_50 = arith.constant 0 : index
    %143 = vector.load %arg5[%c0_47, %c5_48, %c0_49, %c0_50] : memref<1x8x10x128xf32, #tpu.memory_space<vmem>>, vector<1x1x10x128xf32>
    %144 = vector.shape_cast %143 : vector<1x1x10x128xf32> to vector<10x128xf32>
    %145 = vector.shape_cast %142 : vector<10x128xf32> to vector<1x1x10x128xf32>
    tpu.vector_store %arg5[%c0_47, %c5_48, %c0_49, %c0_50], %145 {strides = array<i32>} : memref<1x8x10x128xf32, #tpu.memory_space<vmem>>, vector<1x1x10x128xf32>,
    %c24 = arith.constant 24 : index
    %146 = memref.load %arg2[%c24] : memref<32xf32, #tpu.memory_space<smem>>
    %147 = vector.broadcast %146 : f32 to vector<10x128xf32>
    %148 = arith.mulf %1, %147 : vector<10x128xf32>
    %c25 = arith.constant 25 : index
    %149 = memref.load %arg2[%c25] : memref<32xf32, #tpu.memory_space<smem>>
    %150 = vector.broadcast %149 : f32 to vector<10x128xf32>
    %151 = arith.mulf %3, %150 : vector<10x128xf32>
    %152 = arith.addf %148, %151 : vector<10x128xf32>
    %c26 = arith.constant 26 : index
    %153 = memref.load %arg2[%c26] : memref<32xf32, #tpu.memory_space<smem>>
    %154 = vector.broadcast %153 : f32 to vector<10x128xf32>
    %155 = arith.mulf %5, %154 : vector<10x128xf32>
    %156 = arith.addf %152, %155 : vector<10x128xf32>
    %c27 = arith.constant 27 : index
    %157 = memref.load %arg2[%c27] : memref<32xf32, #tpu.memory_space<smem>>
    %158 = vector.broadcast %157 : f32 to vector<10x128xf32>
    %159 = arith.mulf %7, %158 : vector<10x128xf32>
    %160 = arith.addf %156, %159 : vector<10x128xf32>
    %c6_51 = arith.constant 6 : index
    %161 = memref.load %arg3[%c6_51] : memref<8xf32, #tpu.memory_space<smem>>
    %162 = vector.broadcast %161 : f32 to vector<10x128xf32>
    %163 = arith.addf %160, %162 : vector<10x128xf32>
    %cst_52 = arith.constant 0.000000e+00 : f32
    %164 = vector.broadcast %cst_52 : f32 to vector<10x128xf32>
    %165 = arith.maximumf %163, %164 : vector<10x128xf32>
    %c0_53 = arith.constant 0 : index
    %c6_54 = arith.constant 6 : index
    %c0_55 = arith.constant 0 : index
    %c0_56 = arith.constant 0 : index
    %166 = vector.load %arg5[%c0_53, %c6_54, %c0_55, %c0_56] : memref<1x8x10x128xf32, #tpu.memory_space<vmem>>, vector<1x1x10x128xf32>
    %167 = vector.shape_cast %166 : vector<1x1x10x128xf32> to vector<10x128xf32>
    %168 = vector.shape_cast %165 : vector<10x128xf32> to vector<1x1x10x128xf32>
    tpu.vector_store %arg5[%c0_53, %c6_54, %c0_55, %c0_56], %168 {strides = array<i32>} : memref<1x8x10x128xf32, #tpu.memory_space<vmem>>, vector<1x1x10x128xf32>,
    %c28 = arith.constant 28 : index
    %169 = memref.load %arg2[%c28] : memref<32xf32, #tpu.memory_space<smem>>
    %170 = vector.broadcast %169 : f32 to vector<10x128xf32>
    %171 = arith.mulf %1, %170 : vector<10x128xf32>
    %c29 = arith.constant 29 : index
    %172 = memref.load %arg2[%c29] : memref<32xf32, #tpu.memory_space<smem>>
    %173 = vector.broadcast %172 : f32 to vector<10x128xf32>
    %174 = arith.mulf %3, %173 : vector<10x128xf32>
    %175 = arith.addf %171, %174 : vector<10x128xf32>
    %c30 = arith.constant 30 : index
    %176 = memref.load %arg2[%c30] : memref<32xf32, #tpu.memory_space<smem>>
    %177 = vector.broadcast %176 : f32 to vector<10x128xf32>
    %178 = arith.mulf %5, %177 : vector<10x128xf32>
    %179 = arith.addf %175, %178 : vector<10x128xf32>
    %c31 = arith.constant 31 : index
    %180 = memref.load %arg2[%c31] : memref<32xf32, #tpu.memory_space<smem>>
    %181 = vector.broadcast %180 : f32 to vector<10x128xf32>
    %182 = arith.mulf %7, %181 : vector<10x128xf32>
    %183 = arith.addf %179, %182 : vector<10x128xf32>
    %c7_57 = arith.constant 7 : index
    %184 = memref.load %arg3[%c7_57] : memref<8xf32, #tpu.memory_space<smem>>
    %185 = vector.broadcast %184 : f32 to vector<10x128xf32>
    %186 = arith.addf %183, %185 : vector<10x128xf32>
    %cst_58 = arith.constant 0.000000e+00 : f32
    %187 = vector.broadcast %cst_58 : f32 to vector<10x128xf32>
    %188 = arith.maximumf %186, %187 : vector<10x128xf32>
    %c0_59 = arith.constant 0 : index
    %c7_60 = arith.constant 7 : index
    %c0_61 = arith.constant 0 : index
    %c0_62 = arith.constant 0 : index
    %189 = vector.load %arg5[%c0_59, %c7_60, %c0_61, %c0_62] : memref<1x8x10x128xf32, #tpu.memory_space<vmem>>, vector<1x1x10x128xf32>
    %190 = vector.shape_cast %189 : vector<1x1x10x128xf32> to vector<10x128xf32>
    %191 = vector.shape_cast %188 : vector<10x128xf32> to vector<1x1x10x128xf32>
    tpu.vector_store %arg5[%c0_59, %c7_60, %c0_61, %c0_62], %191 {strides = array<i32>} : memref<1x8x10x128xf32, #tpu.memory_space<vmem>>, vector<1x1x10x128xf32>,
    return
  }
  func.func @transform_0(%arg0: i32, %arg1: i32) -> i32 {
    %c0_i32 = arith.constant 0 : i32
    %c0_i32_0 = arith.constant 0 : i32
    return %c0_i32 : i32
  }
  func.func @transform_1(%arg0: i32, %arg1: i32) -> i32 {
    %c0_i32 = arith.constant 0 : i32
    %c0_i32_0 = arith.constant 0 : i32
    return %c0_i32 : i32
  }
  func.func @transform_2(%arg0: i32, %arg1: i32) -> (i32, i32, i32, i32) {
    %c0_i32 = arith.constant 0 : i32
    %c0_i32_0 = arith.constant 0 : i32
    %c0_i32_1 = arith.constant 0 : i32
    return %arg0, %c0_i32, %arg1, %c0_i32_0 : i32, i32, i32, i32
  }
  func.func @transform_3(%arg0: i32, %arg1: i32) -> (i32, i32, i32, i32) {
    %c0_i32 = arith.constant 0 : i32
    %c0_i32_0 = arith.constant 0 : i32
    %c0_i32_1 = arith.constant 0 : i32
    return %arg0, %c0_i32, %arg1, %c0_i32_0 : i32, i32, i32, i32
  }
}

</mosaic_0001>

<bundles_post_ra>
// kernel: tpu_custom_call.1
= control target key start
LH: loop header
LB: loop body
LE: loop exit
PB: predicated region body
PF: predicated region fallthrough
CT: control target
= control target key end

     0   :  { %8 = vsyncpa [#allocation3], 0  ;;  %s1067_s0 = inlined_call_operand.vmem [shape: f32[32], index: 0, kind: input, shape index: {}]   ;;  %s1068_s1 = inlined_call_operand.vmem [shape: f32[8], index: 1, kind: input, shape index: {}]   ;;  %s1069_s2 = inlined_call_operand.vmem [shape: f32[2,4,10,128], index: 2, kind: input, shape index: {}]   ;;  %s1070_s3 = inlined_call_operand.vmem [shape: f32[2,8,10,128], index: 3, kind: output, shape index: {}]  }
   0x1   :  { %9 = vsyncpa [#allocation5], 0  ;;  %s808_s12 = smov 0   ;;  %s810_s13 = smov 0  }
   0x2   :  { %s812_s14 = smov 0  }
   0x3 LB: > { %s604_s15 = sadd.s32 4294967295, %s784_s14   ;;  %s27_s16 = sadd.s32 1, %s780_s13  ;;  %s784_s14 = sphi %s812_s14, %s15_s14   ;;  %s780_s13 = sphi %s810_s13, %s1073_s13   ;;  %s776_s12 = sphi %s808_s12, %s1072_s12  }
   0x4   : > { %p29_p0 = scmp.ge.s32.totalorder %s27_s16, 2  ;;  %p606_p1 = scmp.ge.s32.totalorder %s784_s14, 1 }
   0x5   : > { %p130_p2 = scmp.lt.s32.totalorder %s784_s14, 3  ;;  %p829_p4 = scmp.eq.s32.totalorder %s604_s15, 0 }
   0x6   : > { %s1075_s16 = smov (%p29_p0, %s27_s16), 0  ;;  %s142_s20 = sshll.u32 %s1067_s0, 4  ;;  %s143_s20 = int_to_ptr.vmem [resolvable:$true] %s142_s20 }
   0x7   : > { %p131_p3 = pnand %p606_p1, %p130_p2  ;;  %s152_s23 = sshll.u32 %s1068_s1, 4  ;;  %s153_s23 = int_to_ptr.vmem [resolvable:$true] %s152_s23 }
   0x8   : > { %s786_s24 = smov [#allocation2]   ;;  %s787_s25 = smov [#allocation4]  }
   0x9   : > { %p687_p5 = pneg %p131_p3 }
   0xa   : > { %178 = sbr.rel (%p131_p3) target bundleno = 83 (0x53), region = 32 }
   0xb   : > { %p688_p6 = pnand %p829_p4, %p687_p5 }
   0xd   : > { %690 = dma.vmem_to_smem (!%p688_p6), %s143_s20, 16, %s786_s24, [#allocation3]  }
   0xe   : > { %693 = dma.vmem_to_smem (!%p688_p6), %s153_s23, 16, %s787_s25, [#allocation5]  }
   0xf   : > { %767 = dma.done.wait (%p829_p4), [#allocation3], 16  }
  0x10   : > { %769 = vsyncadd (%p829_p4), [#allocation3], 4294967280 }
  0x11   : > { %771 = dma.done.wait (%p829_p4), [#allocation5], 16  }
  0x12   : > { %773 = vsyncadd (%p829_p4), [#allocation5], 4294967280 }
  0x13   : > { %190 = sfence }
  0x14   : > { %p218_p7 = scmp.lt.s32.totalorder %s776_s12, 1  ;;  %s248_s26 = sld [smem:[#allocation2]] }
  0x15   : > { %s623_s27 = sld [smem:[#allocation2 + $0x1]] }
  0x16   : > { %s1077_s12 = smov (!%p218_p7, %s776_s12), 1  ;;  %s624_s28 = sld [smem:[#allocation2 + $0x2]] }
  0x17   : > { %s677_s29 = sshll.u32 %s1077_s12, 6  ;;  %s625_s6 = sld [smem:[#allocation2 + $0x3]] }
  0x18   : > { %s225_s5 = scalar_lea.vmem %s1069_s2, %s677_s29  ;;  %s864_s7 = sld [smem:[#allocation4]] }
  0x19   : > { %v857_v0 = vld [vmem:[%s225_s5] sm:$0xff]  ;;  %v859_v1 = vld [vmem:[%s225_s5 + $0x10] sm:$0xff]  ;;  %v866_v6 = vld [vmem:[%s225_s5 + $0x8] sm:$0x3]  ;;  %s626_s8 = sld [smem:[#allocation2 + $0x4]]  ;;  %s678_s18 = sshll.u32 %s1077_s12, 7 }
  0x1a   : > { %v249_v2 = vstv %s248_s26  ;;  %v861_v3 = vld [vmem:[%s225_s5 + $0x20] sm:$0xff]  ;;  %v869_v8 = vld [vmem:[%s225_s5 + $0x18] sm:$0x3]  ;;  %v871_v9 = vld [vmem:[%s225_s5 + $0x28] sm:$0x3]  ;;  %s627_s9 = sld [smem:[#allocation2 + $0x5]]  ;;  %s903_s23 = scalar_lea.vmem %s1070_s3, %s678_s18 }
  0x1b   : > { %v250_v4 = vmul.f32 %v249_v2, %v857_v0  ;;  %v253_v5 = vstv %s623_s27  ;;  %v251_v10 = vmul.f32 %v249_v2, %v866_v6  ;;  %v875_v13 = vld [vmem:[%s225_s5 + $0x30] sm:$0xff]  ;;  %v878_v16 = vld [vmem:[%s225_s5 + $0x38] sm:$0x3]  ;;  %s628_s10 = sld [smem:[#allocation2 + $0x6]] }
  0x1c   : > { %v254_v7 = vmul.f32 %v859_v1, %v253_v5  ;;  %v259_v11 = vstv %s624_s28  ;;  %v255_v12 = vmul.f32 %v869_v8, %v253_v5  ;;  %s881_s11 = sld [smem:[#allocation2 + $0x7]] }
  0x1d   : > { %v260_v15 = vmul.f32 %v861_v3, %v259_v11  ;;  %v261_v17 = vmul.f32 %v871_v9, %v259_v11  ;;  %v265_v20 = vstv %s625_s6  ;;  %s885_s15 = sld [smem:[#allocation4 + $0x1]] }
  0x1e   : > { %v256_v14 = vadd.f32 %v254_v7, %v250_v4  ;;  %v257_v18 = vadd.f32 %v255_v12, %v251_v10  ;;  %v266_v21 = vmul.f32 %v875_v13, %v265_v20  ;;  %v267_v23 = vmul.f32 %v878_v16, %v265_v20  ;;  %s888_s17 = sld [smem:[#allocation2 + $0x8]] }
  0x1f   : > { %v271_v24 = vstv %s864_s7  ;;  %v279_v27 = vstv %s626_s8  ;;  %s891_s19 = sld [smem:[#allocation2 + $0x9]] }
  0x20   : > { %v262_v19 = vadd.f32 %v260_v15, %v256_v14  ;;  %v263_v22 = vadd.f32 %v261_v17, %v257_v18  ;;  %v280_v28 = vmul.f32 %v279_v27, %v857_v0  ;;  %v283_v29 = vstv %s627_s9  ;;  %s895_s20 = sld [smem:[#allocation2 + $0xa]] }
  0x21   : > { %v281_v30 = vmul.f32 %v279_v27, %v866_v6  ;;  %v284_v33 = vmul.f32 %v859_v1, %v283_v29  ;;  %v289_v34 = vstv %s628_s10  ;;  %s898_s12 = sld [smem:[#allocation2 + $0xb]]  ;;  %v285_v37 = vmul.f32 %v869_v8, %v283_v29 }
  0x22   : > { %v268_v25 = vadd.f32 %v266_v21, %v262_v19  ;;  %v269_v26 = vadd.f32 %v267_v23, %v263_v22  ;;  %v290_v35 = vmul.f32 %v861_v3, %v289_v34  ;;  %v295_v36 = vstv %s881_s11  ;;  %s909_s24 = sld [smem:[#allocation4 + $0x2]] }
  0x23   : > { %v291_v38 = vmul.f32 %v871_v9, %v289_v34  ;;  %v286_v41 = vadd.f32 %v284_v33, %v280_v28  ;;  %v296_v42 = vmul.f32 %v875_v13, %v295_v36  ;;  %s912_s25 = sld [smem:[#allocation2 + $0xc]]  ;;  %v301_v43 = vstv %s885_s15 }
  0x24   : > { %v272_v31 = vadd.f32 %v271_v24, %v268_v25  ;;  %v273_v32 = vadd.f32 %v271_v24, %v269_v26  ;;  %v287_v44 = vadd.f32 %v285_v37, %v281_v30  ;;  %v297_v45 = vmul.f32 %v878_v16, %v295_v36  ;;  %s917_s26 = sld [smem:[#allocation2 + $0xd]] }
  0x25   : > { %v310_v46 = vstv %s888_s17  ;;  %v292_v47 = vadd.f32 %v290_v35, %v286_v41  ;;  %v314_v49 = vstv %s891_s19  ;;  %s923_s27 = sld [smem:[#allocation2 + $0xe]] }
  0x26   : > { %v274_v39 = vmax.f32 %v272_v31, 0.0  ;;  %v275_v40 = vmax.f32 %v273_v32, 0.0  ;;  %v311_v48 = vmul.f32 %v310_v46, %v857_v0  ;;  %v312_v50 = vmul.f32 %v310_v46, %v866_v6  ;;  %s929_s28 = sld [smem:[#allocation2 + $0xf]] }
  0x27   : > { %v293_v51 = vadd.f32 %v291_v38, %v287_v44  ;;  %v315_v52 = vmul.f32 %v859_v1, %v314_v49  ;;  %v320_v53 = vstv %s895_s20  ;;  %v316_v54 = vmul.f32 %v869_v8, %v314_v49  ;;  %s934_s29 = sld [smem:[#allocation4 + $0x3]] }
  0x28   : > { %276 = vst [vmem:[%s903_s23] sm:$0xff] %v274_v39  ;;  %v298_v55 = vadd.f32 %v296_v42, %v292_v47  ;;  %v321_v56 = vmul.f32 %v861_v3, %v320_v53  ;;  %v326_v57 = vstv %s898_s12  ;;  %v322_v58 = vmul.f32 %v871_v9, %v320_v53  ;;  %s938_s30 = sld [smem:[#allocation2 + $0x10]] }
  0x29   : > { %277 = vst [vmem:[%s903_s23 + $0x8] sm:$0x3] %v275_v40  ;;  %v299_v59 = vadd.f32 %v297_v45, %v293_v51  ;;  %v317_v60 = vadd.f32 %v315_v52, %v311_v48  ;;  %v327_v61 = vmul.f32 %v875_v13, %v326_v57  ;;  %v332_v62 = vstv %s909_s24  ;;  %s942_s4 = sld [smem:[#allocation2 + $0x11]] }
  0x2a   : > { %v302_v63 = vadd.f32 %v301_v43, %v298_v55  ;;  %v318_v2 = vadd.f32 %v316_v54, %v312_v50  ;;  %v328_v4 = vmul.f32 %v878_v16, %v326_v57  ;;  %v341_v5 = vstv %s912_s25  ;;  %s946_s5 = sld [smem:[#allocation2 + $0x12]] }
  0x2b   : > { %v303_v7 = vadd.f32 %v301_v43, %v299_v59  ;;  %v323_v10 = vadd.f32 %v321_v56, %v317_v60  ;;  %v342_v11 = vmul.f32 %v341_v5, %v857_v0  ;;  %v345_v12 = vstv %s917_s26  ;;  %s950_s6 = sld [smem:[#allocation2 + $0x13]] }
  0x2c   : > { %v304_v14 = vmax.f32 %v302_v63, 0.0  ;;  %v324_v15 = vadd.f32 %v322_v58, %v318_v2  ;;  %v346_v17 = vmul.f32 %v859_v1, %v345_v12  ;;  %v351_v18 = vstv %s923_s27  ;;  %s954_s7 = sld [smem:[#allocation4 + $0x4]] }
  0x2d   : > { %v305_v19 = vmax.f32 %v303_v7, 0.0  ;;  %v329_v20 = vadd.f32 %v327_v61, %v323_v10  ;;  %v352_v21 = vmul.f32 %v861_v3, %v351_v18  ;;  %v357_v22 = vstv %s929_s28  ;;  %s959_s8 = sld [smem:[#allocation2 + $0x14]] }
  0x2e   : > { %631 = vst [vmem:[%s903_s23 + $0x10] sm:$0xff] %v304_v14  ;;  %v330_v23 = vadd.f32 %v328_v4, %v324_v15  ;;  %v348_v24 = vadd.f32 %v346_v17, %v342_v11  ;;  %v358_v25 = vmul.f32 %v875_v13, %v357_v22  ;;  %v363_v26 = vstv %s934_s29  ;;  %s965_s9 = sld [smem:[#allocation2 + $0x15]] }
  0x2f   : > { %632 = vst [vmem:[%s903_s23 + $0x18] sm:$0x3] %v305_v19  ;;  %v333_v27 = vadd.f32 %v332_v62, %v329_v20  ;;  %v343_v28 = vmul.f32 %v341_v5, %v866_v6  ;;  %v347_v29 = vmul.f32 %v869_v8, %v345_v12  ;;  %v353_v30 = vmul.f32 %v871_v9, %v351_v18  ;;  %s969_s10 = sld [smem:[#allocation2 + $0x16]] }
  0x30   : > { %v334_v31 = vadd.f32 %v332_v62, %v330_v23  ;;  %v354_v32 = vadd.f32 %v352_v21, %v348_v24  ;;  %v359_v33 = vmul.f32 %v878_v16, %v357_v22  ;;  %v372_v34 = vstv %s938_s30  ;;  %s973_s11 = sld [smem:[#allocation2 + $0x17]] }
  0x31   : > { %v335_v35 = vmax.f32 %v333_v27, 0.0  ;;  %v349_v36 = vadd.f32 %v347_v29, %v343_v28  ;;  %v373_v37 = vmul.f32 %v372_v34, %v857_v0  ;;  %v376_v38 = vstv %s942_s4  ;;  %s977_s15 = sld [smem:[#allocation4 + $0x5]] }
  0x32   : > { %v336_v39 = vmax.f32 %v334_v31, 0.0  ;;  %v360_v40 = vadd.f32 %v358_v25, %v354_v32  ;;  %v377_v41 = vmul.f32 %v859_v1, %v376_v38  ;;  %v382_v42 = vstv %s946_s5  ;;  %s983_s17 = sld [smem:[#allocation2 + $0x18]] }
  0x33   : > { %638 = vst [vmem:[%s903_s23 + $0x20] sm:$0xff] %v335_v35  ;;  %v355_v43 = vadd.f32 %v353_v30, %v349_v36  ;;  %v383_v44 = vmul.f32 %v861_v3, %v382_v42  ;;  %v388_v45 = vstv %s950_s6  ;;  %v394_v46 = vstv %s954_s7  ;;  %s988_s18 = sld [smem:[#allocation2 + $0x19]] }
  0x34   : > { %639 = vst [vmem:[%s903_s23 + $0x28] sm:$0x3] %v336_v39  ;;  %v364_v47 = vadd.f32 %v363_v26, %v360_v40  ;;  %v379_v48 = vadd.f32 %v377_v41, %v373_v37  ;;  %v389_v49 = vmul.f32 %v875_v13, %v388_v45  ;;  %v374_v50 = vmul.f32 %v372_v34, %v866_v6  ;;  %s993_s19 = sld [smem:[#allocation2 + $0x1a]] }
  0x35   : > { %v361_v51 = vadd.f32 %v359_v33, %v355_v43  ;;  %v378_v52 = vmul.f32 %v869_v8, %v376_v38  ;;  %v384_v53 = vmul.f32 %v871_v9, %v382_v42  ;;  %v390_v54 = vmul.f32 %v878_v16, %v388_v45  ;;  %s997_s20 = sld [smem:[#allocation2 + $0x1b]] }
  0x36   : > { %v366_v55 = vmax.f32 %v364_v47, 0.0  ;;  %v385_v56 = vadd.f32 %v383_v44, %v379_v48  ;;  %v403_v57 = vstv %s959_s8  ;;  %v407_v58 = vstv %s965_s9  ;;  %s1001_s12 = sld [smem:[#allocation4 + $0x6]] }
  0x37   : > { %v365_v59 = vadd.f32 %v363_v26, %v361_v51  ;;  %v380_v60 = vadd.f32 %v378_v52, %v374_v50  ;;  %v404_v61 = vmul.f32 %v403_v57, %v857_v0  ;;  %v408_v62 = vmul.f32 %v859_v1, %v407_v58  ;;  %s1008_s21 = sld [smem:[#allocation2 + $0x1c]] }
  0x38   : > { %645 = vst [vmem:[%s903_s23 + $0x30] sm:$0xff] %v366_v55  ;;  %v391_v63 = vadd.f32 %v389_v49, %v385_v56  ;;  %v413_v2 = vstv %s969_s10  ;;  %v419_v4 = vstv %s973_s11  ;;  %v425_v5 = vstv %s977_s15  ;;  %s1013_s22 = sld [smem:[#allocation2 + $0x1d]] }
  0x39   : > { %v367_v7 = vmax.f32 %v365_v59, 0.0  ;;  %v386_v10 = vadd.f32 %v384_v53, %v380_v60  ;;  %v410_v11 = vadd.f32 %v408_v62, %v404_v61  ;;  %v414_v12 = vmul.f32 %v861_v3, %v413_v2  ;;  %s1018_s24 = sld [smem:[#allocation2 + $0x1e]] }
  0x3a   : > { %v395_v14 = vadd.f32 %v394_v46, %v391_v63  ;;  %v420_v15 = vmul.f32 %v875_v13, %v419_v4  ;;  %v405_v17 = vmul.f32 %v403_v57, %v866_v6  ;;  %v409_v18 = vmul.f32 %v869_v8, %v407_v58  ;;  %s1022_s25 = sld [smem:[#allocation2 + $0x1f]] }
  0x3b   : > { %646 = vst [vmem:[%s903_s23 + $0x38] sm:$0x3] %v367_v7  ;;  %v392_v19 = vadd.f32 %v390_v54, %v386_v10  ;;  %v416_v20 = vadd.f32 %v414_v12, %v410_v11  ;;  %v415_v21 = vmul.f32 %v871_v9, %v413_v2  ;;  %v421_v22 = vmul.f32 %v878_v16, %v419_v4  ;;  %s1034_s26 = sld [smem:[#allocation4 + $0x7]] }
  0x3c   : > { %v397_v23 = vmax.f32 %v395_v14, 0.0  ;;  %v411_v24 = vadd.f32 %v409_v18, %v405_v17  ;;  %v434_v25 = vstv %s983_s17  ;;  %v438_v26 = vstv %s988_s18 }
  0x3d   : > { %v396_v27 = vadd.f32 %v394_v46, %v392_v19  ;;  %v422_v28 = vadd.f32 %v420_v15, %v416_v20  ;;  %v435_v29 = vmul.f32 %v434_v25, %v857_v0  ;;  %v439_v30 = vmul.f32 %v859_v1, %v438_v26 }
  0x3e   : > { %652 = vst [vmem:[%s903_s23 + $0x40] sm:$0xff] %v397_v23  ;;  %v417_v31 = vadd.f32 %v415_v21, %v411_v24  ;;  %v444_v32 = vstv %s993_s19  ;;  %v450_v33 = vstv %s997_s20  ;;  %v456_v34 = vstv %s1001_s12 }
  0x3f   : > { %v398_v35 = vmax.f32 %v396_v27, 0.0  ;;  %v426_v36 = vadd.f32 %v425_v5, %v422_v28  ;;  %v441_v37 = vadd.f32 %v439_v30, %v435_v29  ;;  %v445_v38 = vmul.f32 %v861_v3, %v444_v32 }
  0x40   : > { %v423_v39 = vadd.f32 %v421_v22, %v417_v31  ;;  %v451_v40 = vmul.f32 %v875_v13, %v450_v33  ;;  %v436_v41 = vmul.f32 %v434_v25, %v866_v6  ;;  %v440_v42 = vmul.f32 %v869_v8, %v438_v26 }
  0x41   : > { %653 = vst [vmem:[%s903_s23 + $0x48] sm:$0x3] %v398_v35  ;;  %v428_v43 = vmax.f32 %v426_v36, 0.0  ;;  %v447_v44 = vadd.f32 %v445_v38, %v441_v37  ;;  %v446_v45 = vmul.f32 %v871_v9, %v444_v32  ;;  %v452_v46 = vmul.f32 %v878_v16, %v450_v33 }
  0x42   : > { %v427_v47 = vadd.f32 %v425_v5, %v423_v39  ;;  %v442_v48 = vadd.f32 %v440_v42, %v436_v41  ;;  %v465_v49 = vstv %s1008_s21  ;;  %v469_v50 = vstv %s1013_s22 }
  0x43   : > { %659 = vst [vmem:[%s903_s23 + $0x50] sm:$0xff] %v428_v43  ;;  %v453_v51 = vadd.f32 %v451_v40, %v447_v44  ;;  %v466_v52 = vmul.f32 %v465_v49, %v857_v0  ;;  %v470_v53 = vmul.f32 %v859_v1, %v469_v50  ;;  %v475_v54 = vstv %s1018_s24 }
  0x44   : > { %v429_v55 = vmax.f32 %v427_v47, 0.0  ;;  %v448_v56 = vadd.f32 %v446_v45, %v442_v48  ;;  %v476_v57 = vmul.f32 %v861_v3, %v475_v54  ;;  %v481_v58 = vstv %s1022_s25 }
  0x45   : > { %v457_v59 = vadd.f32 %v456_v34, %v453_v51  ;;  %v472_v60 = vadd.f32 %v470_v53, %v466_v52  ;;  %v482_v61 = vmul.f32 %v875_v13, %v481_v58  ;;  %v467_v63 = vmul.f32 %v465_v49, %v866_v6 }
  0x46   : > { %660 = vst [vmem:[%s903_s23 + $0x58] sm:$0x3] %v429_v55  ;;  %v454_v62 = vadd.f32 %v452_v46, %v448_v56  ;;  %v471_v0 = vmul.f32 %v869_v8, %v469_v50  ;;  %v477_v1 = vmul.f32 %v871_v9, %v475_v54  ;;  %v487_v5 = vstv %s1034_s26 }
  0x47   : > { %v459_v2 = vmax.f32 %v457_v59, 0.0  ;;  %v478_v4 = vadd.f32 %v476_v57, %v472_v60  ;;  %v483_v10 = vmul.f32 %v878_v16, %v481_v58 }
  0x48   : > { %v458_v3 = vadd.f32 %v456_v34, %v454_v62  ;;  %v473_v7 = vadd.f32 %v471_v0, %v467_v63 }
  0x49   : > { %666 = vst [vmem:[%s903_s23 + $0x60] sm:$0xff] %v459_v2  ;;  %v484_v13 = vadd.f32 %v482_v61, %v478_v4 }
  0x4a   : > { %v460_v11 = vmax.f32 %v458_v3, 0.0  ;;  %v479_v12 = vadd.f32 %v477_v1, %v473_v7 }
  0x4b   : > { %v488_v14 = vadd.f32 %v487_v5, %v484_v13 }
  0x4c   : > { %667 = vst [vmem:[%s903_s23 + $0x68] sm:$0x3] %v460_v11  ;;  %v485_v6 = vadd.f32 %v483_v10, %v479_v12 }
  0x4d   : > { %v490_v15 = vmax.f32 %v488_v14, 0.0 }
  0x4e   : > { %v489_v8 = vadd.f32 %v487_v5, %v485_v6 }
  0x4f   : > { %673 = vst [vmem:[%s903_s23 + $0x70] sm:$0xff] %v490_v15 }
  0x50   : > { %v491_v9 = vmax.f32 %v489_v8, 0.0 }
  0x52   : > { %674 = vst [vmem:[%s903_s23 + $0x78] sm:$0x3] %v491_v9 }
  0x53 PF: > { %s15_s14 = sadd.s32 1, %s784_s14   ;;  %s1072_s12 = smov %s780_s13 }
  0x54   : > { %p12_p8 = scmp.ge.s32.totalorder %s15_s14, 4   ;;  %s1073_s13 = smov %s1075_s16 }
  0x56   :  { %14 = sbr.rel (!%p12_p8) target bundleno = 3 (0x3), region = 81 }
  0x5b   :  { %525 = vsyncpa [#allocation3], 1 }
  0x5c   :  { %527 = vsyncpa [#allocation3 + $0x1], 1 }
  0x5d   :  { %528 = vsyncpa [#allocation5], 1 }

</bundles_post_ra>
